<compile_context>
chip_gen: v7x
topology: tpu7x:2x2x1
jax: 0.10.0
libtpu: 0.0.40
codegen_flags: <defaults>
</compile_context>

<pallas_src>
import functools

import jax
import jax.numpy as jnp
from jax.experimental import pallas as pl
from jax.experimental.pallas import tpu as pltpu

LN_EPS = 1e-5  # PyTorch nn.LayerNorm default


def _round_up(n, m):
    return ((n + m - 1) // m) * m


def _padded_layernorm(h, gamma, beta, d_true):
    """LayerNorm over the first `d_true` lanes of a zero-padded [tile, d_pad] block.

    Padded lanes of `h` are exactly 0, so the plain lane-sum is the true sum and the
    padded lanes' contribution to sum(centered^2) is exactly (d_pad - d_true) * mean^2,
    which we subtract instead of masking (no iota / select needed).
    """
    d_pad = h.shape[-1]
    inv_d = 1.0 / float(d_true)
    mean = jnp.sum(h, axis=-1, keepdims=True) * inv_d
    centered = h - mean
    sq = jnp.sum(centered * centered, axis=-1, keepdims=True)
    if d_pad != d_true:
        sq = sq - float(d_pad - d_true) * (mean * mean)
    inv = jax.lax.rsqrt(sq * inv_d + LN_EPS)
    # gamma/beta are zero in the padded region -> padded output lanes stay exactly 0
    return centered * (inv * gamma) + beta


def _mish(h):
    # mish(x) = x * tanh(softplus(x)) = x * (t^2 + 2t) / (t^2 + 2t + 2), t = exp(x).
    # Clamp exp argument: for x >= 30 the ratio is 1.0 to f32 precision.
    t = jnp.exp(jnp.minimum(h, 30.0))
    num = t * (t + 2.0)
    return h * (num / (num + 2.0))


def layer_set_kernel(x_ref,
                     w1_ref, b1_ref, g1_ref, be1_ref,
                     w2_ref, b2_ref, g2_ref, be2_ref,
                     w3_ref, b3_ref, g3_ref, be3_ref,
                     o_ref, *, hidden_dim, out_dim):
    x = x_ref[...].astype(jnp.float32)

    # Layer 1: Linear + LayerNorm
    h = jnp.dot(x, w1_ref[...], preferred_element_type=jnp.float32) + b1_ref[...]
    h = _padded_layernorm(h, g1_ref[...], be1_ref[...], hidden_dim)

    # Layer 2: Linear + LayerNorm
    h = jnp.dot(h, w2_ref[...], preferred_element_type=jnp.float32) + b2_ref[...]
    h = _padded_layernorm(h, g2_ref[...], be2_ref[...], hidden_dim)

    # Layer 3: Linear + LayerNorm
    h = jnp.dot(h, w3_ref[...], preferred_element_type=jnp.float32) + b3_ref[...]
    h = _padded_layernorm(h, g3_ref[...], be3_ref[...], out_dim)

    # Mish activation (Dropout is identity in eval mode); padded lanes stay 0.
    o_ref[...] = _mish(h).astype(o_ref.dtype)


def _pick_tile(n, dp, hp, op, tile_n):
    """Largest 8-aligned batch tile <= tile_n that fits a conservative VMEM budget."""
    tile = _round_up(min(tile_n, _round_up(n, 8)), 8)
    # Resident params (conservatively counted double-buffered) + per-tile activations.
    weight_bytes = 2 * 4 * (dp * hp + hp * hp + hp * op + 8 * (3 * hp + 3 * op))
    budget = 24 * 1024 * 1024
    while tile > 8:
        act_bytes = 4 * tile * (2 * dp + 3 * hp + 2 * op)
        if weight_bytes + act_bytes <= budget:
            break
        tile = _round_up(max(tile // 2, 8), 8)
    return tile


@functools.partial(jax.jit, static_argnames=("tile_n",))
def layer_set_forward(x, params, *, tile_n=512):
    (w1, b1, g1, be1, w2, b2, g2, be2, w3, b3, g3, be3) = params
    N, data_dim = x.shape
    hidden_dim = w1.shape[1]
    out_dim = w3.shape[1]

    # Lane-dense padded feature dims.
    dp = _round_up(data_dim, 128)
    hp = _round_up(hidden_dim, 128)
    op = _round_up(out_dim, 128)

    # Batch tile: big for throughput, never larger than the (8-aligned) batch,
    # shrunk if the resident weights + activations would bust the VMEM budget.
    tile_eff = _pick_tile(N, dp, hp, op, tile_n)
    n_pad = _round_up(N, tile_eff)
    n_tiles = n_pad // tile_eff

    def pad2(a, rows, cols):
        return jnp.pad(a, ((0, rows - a.shape[0]), (0, cols - a.shape[1])))

    x_p = pad2(x, n_pad, dp)
    padded = [
        pad2(w1, dp, hp), pad2(b1, 1, hp), pad2(g1, 1, hp), pad2(be1, 1, hp),
        pad2(w2, hp, hp), pad2(b2, 1, hp), pad2(g2, 1, hp), pad2(be2, 1, hp),
        pad2(w3, hp, op), pad2(b3, 1, op), pad2(g3, 1, op), pad2(be3, 1, op),
    ]

    def full_spec(arr):
        # Whole-array block, resident in VMEM across the entire batch grid.
        return pl.BlockSpec(arr.shape, lambda i: (0, 0))

    x_spec = pl.BlockSpec((tile_eff, dp), lambda i: (i, 0))
    o_spec = pl.BlockSpec((tile_eff, op), lambda i: (i, 0))

    kernel = functools.partial(layer_set_kernel,
                               hidden_dim=hidden_dim, out_dim=out_dim)

    # Advisory cost hint for XLA's scheduler around the custom call.
    flops = 2 * n_pad * (dp * hp + hp * hp + hp * op) + 10 * n_pad * (2 * hp + 2 * op)
    bytes_accessed = 4 * (n_pad * dp + n_pad * op
                          + dp * hp + hp * hp + hp * op + 6 * hp + 6 * op)
    cost = pl.CostEstimate(flops=flops,
                           transcendentals=n_pad * op,  # one exp per output element
                           bytes_accessed=bytes_accessed)

    out_p = pl.pallas_call(
        kernel,
        out_shape=jax.ShapeDtypeStruct((n_pad, op), x.dtype),
        grid_spec=pltpu.PrefetchScalarGridSpec(
            num_scalar_prefetch=0,
            grid=(n_tiles,),
            in_specs=[x_spec] + [full_spec(a) for a in padded],
            out_specs=o_spec,
        ),
        compiler_params=pltpu.CompilerParams(
            dimension_semantics=("parallel",),   # shards batch tiles across v7x's 2 TCs
            vmem_limit_bytes=32 * 1024 * 1024,   # safe on v5e/v6e/v7x; plenty for these tiles
        ),
        cost_estimate=cost,
    )(x_p, *padded)

    # Drop batch padding and the padded output lanes.
    return out_p[:N, :out_dim]


def init_params(key, data_dim, hidden_dim, out_dim):
    """Deterministic init mimicking PyTorch defaults (kaiming-uniform linear, LN gamma=1 beta=0)."""
    dims = [(data_dim, hidden_dim), (hidden_dim, hidden_dim), (hidden_dim, out_dim)]
    params = []
    for (ind, outd) in dims:
        key, kw, kb = jax.random.split(key, 3)
        bound = 1.0 / jnp.sqrt(float(ind))
        # stored as [in, out] so kernel computes x @ W (== x @ W_torch.T)
        w = jax.random.uniform(kw, (ind, outd), jnp.float32, -bound, bound)
        b = jax.random.uniform(kb, (1, outd), jnp.float32, -bound, bound)
        gamma = jnp.ones((1, outd), jnp.float32)
        beta = jnp.zeros((1, outd), jnp.float32)
        params += [w, b, gamma, beta]
    return tuple(params)


def reference_forward(x, params):
    """Pure-JAX reference for sanity checking (eval-mode: Dropout is identity)."""
    (w1, b1, g1, be1, w2, b2, g2, be2, w3, b3, g3, be3) = params

    def ln(h, g, b):
        mu = jnp.mean(h, axis=-1, keepdims=True)
        c = h - mu
        v = jnp.mean(c * c, axis=-1, keepdims=True)
        return c / jnp.sqrt(v + LN_EPS) * g + b

    mm = functools.partial(jnp.dot, precision=jax.lax.Precision.HIGHEST)
    h = ln(mm(x, w1) + b1, g1, be1)
    h = ln(mm(h, w2) + b2, g2, be2)
    h = ln(mm(h, w3) + b3, g3, be3)
    return h * jnp.tanh(jax.nn.softplus(h))


if __name__ == "__main__":
    key = jax.random.PRNGKey(0)

    # N deliberately not a multiple of 8 to exercise batch padding / slicing.
    N, DATA_DIM, HIDDEN_DIM, OUT_DIM = 20, 32, 32, 16

    key, kx, kp = jax.random.split(key, 3)
    x = jax.random.normal(kx, (N, DATA_DIM), jnp.float32)
    params = init_params(kp, DATA_DIM, HIDDEN_DIM, OUT_DIM)

    out = layer_set_forward(x, params, tile_n=512)
    out = jax.block_until_ready(out)

    ref = reference_forward(x, params)
    assert out.shape == (N, OUT_DIM)
    assert jnp.allclose(out, ref, atol=1e-5, rtol=1e-5), "mismatch vs reference"

    print("KERNEL_OK")
</pallas_src>

<mosaic_0001>
module attributes {stable_mosaic.version = 11 : i64} {
  func.func @layer_set_kernel(%arg0: i32, %arg1: memref<24x128xf32, #tpu.memory_space<vmem>>, %arg2: memref<128x128xf32, #tpu.memory_space<vmem>>, %arg3: memref<1x128xf32, #tpu.memory_space<vmem>>, %arg4: memref<1x128xf32, #tpu.memory_space<vmem>>, %arg5: memref<1x128xf32, #tpu.memory_space<vmem>>, %arg6: memref<128x128xf32, #tpu.memory_space<vmem>>, %arg7: memref<1x128xf32, #tpu.memory_space<vmem>>, %arg8: memref<1x128xf32, #tpu.memory_space<vmem>>, %arg9: memref<1x128xf32, #tpu.memory_space<vmem>>, %arg10: memref<128x128xf32, #tpu.memory_space<vmem>>, %arg11: memref<1x128xf32, #tpu.memory_space<vmem>>, %arg12: memref<1x128xf32, #tpu.memory_space<vmem>>, %arg13: memref<1x128xf32, #tpu.memory_space<vmem>>, %arg14: memref<24x128xf32, #tpu.memory_space<vmem>>) attributes {dimension_semantics = [#tpu.dimension_semantics<parallel>], iteration_bounds = array<i64: 1>, scalar_prefetch = 0 : i64, scratch_operands = 0 : i64, tpu.core_type = #tpu.core_type<tc>, window_params = [{transform_indices = @transform_0, window_bounds = array<i64: 24, 128>}, {pipeline_mode = #tpu.pipeline_mode<synchronous>, transform_indices = @transform_1, window_bounds = array<i64: 128, 128>}, {pipeline_mode = #tpu.pipeline_mode<synchronous>, transform_indices = @transform_2, window_bounds = array<i64: 1, 128>}, {pipeline_mode = #tpu.pipeline_mode<synchronous>, transform_indices = @transform_3, window_bounds = array<i64: 1, 128>}, {pipeline_mode = #tpu.pipeline_mode<synchronous>, transform_indices = @transform_4, window_bounds = array<i64: 1, 128>}, {pipeline_mode = #tpu.pipeline_mode<synchronous>, transform_indices = @transform_5, window_bounds = array<i64: 128, 128>}, {pipeline_mode = #tpu.pipeline_mode<synchronous>, transform_indices = @transform_6, window_bounds = array<i64: 1, 128>}, {pipeline_mode = #tpu.pipeline_mode<synchronous>, transform_indices = @transform_7, window_bounds = array<i64: 1, 128>}, {pipeline_mode = #tpu.pipeline_mode<synchronous>, transform_indices = @transform_8, window_bounds = array<i64: 1, 128>}, {pipeline_mode = #tpu.pipeline_mode<synchronous>, transform_indices = @transform_9, window_bounds = array<i64: 128, 128>}, {pipeline_mode = #tpu.pipeline_mode<synchronous>, transform_indices = @transform_10, window_bounds = array<i64: 1, 128>}, {pipeline_mode = #tpu.pipeline_mode<synchronous>, transform_indices = @transform_11, window_bounds = array<i64: 1, 128>}, {pipeline_mode = #tpu.pipeline_mode<synchronous>, transform_indices = @transform_12, window_bounds = array<i64: 1, 128>}, {transform_indices = @transform_13, window_bounds = array<i64: 24, 128>}]} {
    %c0 = arith.constant 0 : index
    %c0_0 = arith.constant 0 : index
    %0 = vector.load %arg1[%c0, %c0_0] : memref<24x128xf32, #tpu.memory_space<vmem>>, vector<24x128xf32>
    %c0_1 = arith.constant 0 : index
    %c0_2 = arith.constant 0 : index
    %1 = vector.load %arg2[%c0_1, %c0_2] : memref<128x128xf32, #tpu.memory_space<vmem>>, vector<128x128xf32>
    %cst = arith.constant dense<0.000000e+00> : vector<24x128xf32>
    %2 = tpu.matmul %0, %1, %cst {dimension_numbers = #tpu.dot_dimension_numbers<[1], [0], [0], [1], [0, 0, 1, 1], [], []>} : vector<24x128xf32>, vector<128x128xf32>, vector<24x128xf32> -> vector<24x128xf32>
    %c0_3 = arith.constant 0 : index
    %c0_4 = arith.constant 0 : index
    %3 = vector.load %arg3[%c0_3, %c0_4] : memref<1x128xf32, #tpu.memory_space<vmem>>, vector<1x128xf32>
    %4 = vector.broadcast %3 : vector<1x128xf32> to vector<24x128xf32>
    %5 = arith.addf %2, %4 : vector<24x128xf32>
    %c0_5 = arith.constant 0 : index
    %c0_6 = arith.constant 0 : index
    %6 = vector.load %arg4[%c0_5, %c0_6] : memref<1x128xf32, #tpu.memory_space<vmem>>, vector<1x128xf32>
    %c0_7 = arith.constant 0 : index
    %c0_8 = arith.constant 0 : index
    %7 = vector.load %arg5[%c0_7, %c0_8] : memref<1x128xf32, #tpu.memory_space<vmem>>, vector<1x128xf32>
    %cst_9 = arith.constant dense<0.000000e+00> : vector<24xf32>
    %8 = vector.multi_reduction <add>, %5, %cst_9 [1] : vector<24x128xf32> to vector<24xf32>
    %9 = vector.shape_cast %8 : vector<24xf32> to vector<24x1xf32>
    %cst_10 = arith.constant 3.125000e-02 : f32
    %10 = vector.broadcast %cst_10 : f32 to vector<24x1xf32>
    %11 = arith.mulf %9, %10 : vector<24x1xf32>
    %12 = vector.broadcast %11 : vector<24x1xf32> to vector<24x128xf32>
    %13 = arith.subf %5, %12 : vector<24x128xf32>
    %14 = arith.mulf %13, %13 : vector<24x128xf32>
    %cst_11 = arith.constant dense<0.000000e+00> : vector<24xf32>
    %15 = vector.multi_reduction <add>, %14, %cst_11 [1] : vector<24x128xf32> to vector<24xf32>
    %16 = vector.shape_cast %15 : vector<24xf32> to vector<24x1xf32>
    %17 = arith.mulf %11, %11 : vector<24x1xf32>
    %cst_12 = arith.constant 9.600000e+01 : f32
    %18 = vector.broadcast %cst_12 : f32 to vector<24x1xf32>
    %19 = arith.mulf %18, %17 : vector<24x1xf32>
    %20 = arith.subf %16, %19 : vector<24x1xf32>
    %cst_13 = arith.constant 3.125000e-02 : f32
    %21 = vector.broadcast %cst_13 : f32 to vector<24x1xf32>
    %22 = arith.mulf %20, %21 : vector<24x1xf32>
    %cst_14 = arith.constant 9.99999974E-6 : f32
    %23 = vector.broadcast %cst_14 : f32 to vector<24x1xf32>
    %24 = arith.addf %22, %23 : vector<24x1xf32>
    %25 = math.rsqrt %24 : vector<24x1xf32>
    %26 = vector.broadcast %25 : vector<24x1xf32> to vector<24x128xf32>
    %27 = vector.broadcast %6 : vector<1x128xf32> to vector<24x128xf32>
    %28 = arith.mulf %26, %27 : vector<24x128xf32>
    %29 = arith.mulf %13, %28 : vector<24x128xf32>
    %30 = vector.broadcast %7 : vector<1x128xf32> to vector<24x128xf32>
    %31 = arith.addf %29, %30 : vector<24x128xf32>
    %c0_15 = arith.constant 0 : index
    %c0_16 = arith.constant 0 : index
    %32 = vector.load %arg6[%c0_15, %c0_16] : memref<128x128xf32, #tpu.memory_space<vmem>>, vector<128x128xf32>
    %cst_17 = arith.constant dense<0.000000e+00> : vector<24x128xf32>
    %33 = tpu.matmul %31, %32, %cst_17 {dimension_numbers = #tpu.dot_dimension_numbers<[1], [0], [0], [1], [0, 0, 1, 1], [], []>} : vector<24x128xf32>, vector<128x128xf32>, vector<24x128xf32> -> vector<24x128xf32>
    %c0_18 = arith.constant 0 : index
    %c0_19 = arith.constant 0 : index
    %34 = vector.load %arg7[%c0_18, %c0_19] : memref<1x128xf32, #tpu.memory_space<vmem>>, vector<1x128xf32>
    %35 = vector.broadcast %34 : vector<1x128xf32> to vector<24x128xf32>
    %36 = arith.addf %33, %35 : vector<24x128xf32>
    %c0_20 = arith.constant 0 : index
    %c0_21 = arith.constant 0 : index
    %37 = vector.load %arg8[%c0_20, %c0_21] : memref<1x128xf32, #tpu.memory_space<vmem>>, vector<1x128xf32>
    %c0_22 = arith.constant 0 : index
    %c0_23 = arith.constant 0 : index
    %38 = vector.load %arg9[%c0_22, %c0_23] : memref<1x128xf32, #tpu.memory_space<vmem>>, vector<1x128xf32>
    %cst_24 = arith.constant dense<0.000000e+00> : vector<24xf32>
    %39 = vector.multi_reduction <add>, %36, %cst_24 [1] : vector<24x128xf32> to vector<24xf32>
    %40 = vector.shape_cast %39 : vector<24xf32> to vector<24x1xf32>
    %cst_25 = arith.constant 3.125000e-02 : f32
    %41 = vector.broadcast %cst_25 : f32 to vector<24x1xf32>
    %42 = arith.mulf %40, %41 : vector<24x1xf32>
    %43 = vector.broadcast %42 : vector<24x1xf32> to vector<24x128xf32>
    %44 = arith.subf %36, %43 : vector<24x128xf32>
    %45 = arith.mulf %44, %44 : vector<24x128xf32>
    %cst_26 = arith.constant dense<0.000000e+00> : vector<24xf32>
    %46 = vector.multi_reduction <add>, %45, %cst_26 [1] : vector<24x128xf32> to vector<24xf32>
    %47 = vector.shape_cast %46 : vector<24xf32> to vector<24x1xf32>
    %48 = arith.mulf %42, %42 : vector<24x1xf32>
    %cst_27 = arith.constant 9.600000e+01 : f32
    %49 = vector.broadcast %cst_27 : f32 to vector<24x1xf32>
    %50 = arith.mulf %49, %48 : vector<24x1xf32>
    %51 = arith.subf %47, %50 : vector<24x1xf32>
    %cst_28 = arith.constant 3.125000e-02 : f32
    %52 = vector.broadcast %cst_28 : f32 to vector<24x1xf32>
    %53 = arith.mulf %51, %52 : vector<24x1xf32>
    %cst_29 = arith.constant 9.99999974E-6 : f32
    %54 = vector.broadcast %cst_29 : f32 to vector<24x1xf32>
    %55 = arith.addf %53, %54 : vector<24x1xf32>
    %56 = math.rsqrt %55 : vector<24x1xf32>
    %57 = vector.broadcast %56 : vector<24x1xf32> to vector<24x128xf32>
    %58 = vector.broadcast %37 : vector<1x128xf32> to vector<24x128xf32>
    %59 = arith.mulf %57, %58 : vector<24x128xf32>
    %60 = arith.mulf %44, %59 : vector<24x128xf32>
    %61 = vector.broadcast %38 : vector<1x128xf32> to vector<24x128xf32>
    %62 = arith.addf %60, %61 : vector<24x128xf32>
    %c0_30 = arith.constant 0 : index
    %c0_31 = arith.constant 0 : index
    %63 = vector.load %arg10[%c0_30, %c0_31] : memref<128x128xf32, #tpu.memory_space<vmem>>, vector<128x128xf32>
    %cst_32 = arith.constant dense<0.000000e+00> : vector<24x128xf32>
    %64 = tpu.matmul %62, %63, %cst_32 {dimension_numbers = #tpu.dot_dimension_numbers<[1], [0], [0], [1], [0, 0, 1, 1], [], []>} : vector<24x128xf32>, vector<128x128xf32>, vector<24x128xf32> -> vector<24x128xf32>
    %c0_33 = arith.constant 0 : index
    %c0_34 = arith.constant 0 : index
    %65 = vector.load %arg11[%c0_33, %c0_34] : memref<1x128xf32, #tpu.memory_space<vmem>>, vector<1x128xf32>
    %66 = vector.broadcast %65 : vector<1x128xf32> to vector<24x128xf32>
    %67 = arith.addf %64, %66 : vector<24x128xf32>
    %c0_35 = arith.constant 0 : index
    %c0_36 = arith.constant 0 : index
    %68 = vector.load %arg12[%c0_35, %c0_36] : memref<1x128xf32, #tpu.memory_space<vmem>>, vector<1x128xf32>
    %c0_37 = arith.constant 0 : index
    %c0_38 = arith.constant 0 : index
    %69 = vector.load %arg13[%c0_37, %c0_38] : memref<1x128xf32, #tpu.memory_space<vmem>>, vector<1x128xf32>
    %cst_39 = arith.constant dense<0.000000e+00> : vector<24xf32>
    %70 = vector.multi_reduction <add>, %67, %cst_39 [1] : vector<24x128xf32> to vector<24xf32>
    %71 = vector.shape_cast %70 : vector<24xf32> to vector<24x1xf32>
    %cst_40 = arith.constant 6.250000e-02 : f32
    %72 = vector.broadcast %cst_40 : f32 to vector<24x1xf32>
    %73 = arith.mulf %71, %72 : vector<24x1xf32>
    %74 = vector.broadcast %73 : vector<24x1xf32> to vector<24x128xf32>
    %75 = arith.subf %67, %74 : vector<24x128xf32>
    %76 = arith.mulf %75, %75 : vector<24x128xf32>
    %cst_41 = arith.constant dense<0.000000e+00> : vector<24xf32>
    %77 = vector.multi_reduction <add>, %76, %cst_41 [1] : vector<24x128xf32> to vector<24xf32>
    %78 = vector.shape_cast %77 : vector<24xf32> to vector<24x1xf32>
    %79 = arith.mulf %73, %73 : vector<24x1xf32>
    %cst_42 = arith.constant 1.120000e+02 : f32
    %80 = vector.broadcast %cst_42 : f32 to vector<24x1xf32>
    %81 = arith.mulf %80, %79 : vector<24x1xf32>
    %82 = arith.subf %78, %81 : vector<24x1xf32>
    %cst_43 = arith.constant 6.250000e-02 : f32
    %83 = vector.broadcast %cst_43 : f32 to vector<24x1xf32>
    %84 = arith.mulf %82, %83 : vector<24x1xf32>
    %cst_44 = arith.constant 9.99999974E-6 : f32
    %85 = vector.broadcast %cst_44 : f32 to vector<24x1xf32>
    %86 = arith.addf %84, %85 : vector<24x1xf32>
    %87 = math.rsqrt %86 : vector<24x1xf32>
    %88 = vector.broadcast %87 : vector<24x1xf32> to vector<24x128xf32>
    %89 = vector.broadcast %68 : vector<1x128xf32> to vector<24x128xf32>
    %90 = arith.mulf %88, %89 : vector<24x128xf32>
    %91 = arith.mulf %75, %90 : vector<24x128xf32>
    %92 = vector.broadcast %69 : vector<1x128xf32> to vector<24x128xf32>
    %93 = arith.addf %91, %92 : vector<24x128xf32>
    %cst_45 = arith.constant 3.000000e+01 : f32
    %94 = vector.broadcast %cst_45 : f32 to vector<24x128xf32>
    %95 = arith.minimumf %93, %94 : vector<24x128xf32>
    %96 = math.exp %95 : vector<24x128xf32>
    %cst_46 = arith.constant 2.000000e+00 : f32
    %97 = vector.broadcast %cst_46 : f32 to vector<24x128xf32>
    %98 = arith.addf %96, %97 : vector<24x128xf32>
    %99 = arith.mulf %96, %98 : vector<24x128xf32>
    %cst_47 = arith.constant 2.000000e+00 : f32
    %100 = vector.broadcast %cst_47 : f32 to vector<24x128xf32>
    %101 = arith.addf %99, %100 : vector<24x128xf32>
    %102 = arith.divf %99, %101 : vector<24x128xf32>
    %103 = arith.mulf %93, %102 : vector<24x128xf32>
    %c0_48 = arith.constant 0 : index
    %c0_49 = arith.constant 0 : index
    %104 = vector.load %arg14[%c0_48, %c0_49] : memref<24x128xf32, #tpu.memory_space<vmem>>, vector<24x128xf32>
    tpu.vector_store %arg14[%c0_48, %c0_49], %103 {strides = array<i32>} : memref<24x128xf32, #tpu.memory_space<vmem>>, vector<24x128xf32>,
    return
  }
  func.func @transform_0(%arg0: i32) -> (i32, i32) {
    %c0_i32 = arith.constant 0 : i32
    %c0_i32_0 = arith.constant 0 : i32
    return %arg0, %c0_i32 : i32, i32
  }
  func.func @transform_1(%arg0: i32) -> (i32, i32) {
    %c0_i32 = arith.constant 0 : i32
    %c0_i32_0 = arith.constant 0 : i32
    %c0_i32_1 = arith.constant 0 : i32
    return %c0_i32, %c0_i32_0 : i32, i32
  }
  func.func @transform_2(%arg0: i32) -> (i32, i32) {
    %c0_i32 = arith.constant 0 : i32
    %c0_i32_0 = arith.constant 0 : i32
    %c0_i32_1 = arith.constant 0 : i32
    return %c0_i32, %c0_i32_0 : i32, i32
  }
  func.func @transform_3(%arg0: i32) -> (i32, i32) {
    %c0_i32 = arith.constant 0 : i32
    %c0_i32_0 = arith.constant 0 : i32
    %c0_i32_1 = arith.constant 0 : i32
    return %c0_i32, %c0_i32_0 : i32, i32
  }
  func.func @transform_4(%arg0: i32) -> (i32, i32) {
    %c0_i32 = arith.constant 0 : i32
    %c0_i32_0 = arith.constant 0 : i32
    %c0_i32_1 = arith.constant 0 : i32
    return %c0_i32, %c0_i32_0 : i32, i32
  }
  func.func @transform_5(%arg0: i32) -> (i32, i32) {
    %c0_i32 = arith.constant 0 : i32
    %c0_i32_0 = arith.constant 0 : i32
    %c0_i32_1 = arith.constant 0 : i32
    return %c0_i32, %c0_i32_0 : i32, i32
  }
  func.func @transform_6(%arg0: i32) -> (i32, i32) {
    %c0_i32 = arith.constant 0 : i32
    %c0_i32_0 = arith.constant 0 : i32
    %c0_i32_1 = arith.constant 0 : i32
    return %c0_i32, %c0_i32_0 : i32, i32
  }
  func.func @transform_7(%arg0: i32) -> (i32, i32) {
    %c0_i32 = arith.constant 0 : i32
    %c0_i32_0 = arith.constant 0 : i32
    %c0_i32_1 = arith.constant 0 : i32
    return %c0_i32, %c0_i32_0 : i32, i32
  }
  func.func @transform_8(%arg0: i32) -> (i32, i32) {
    %c0_i32 = arith.constant 0 : i32
    %c0_i32_0 = arith.constant 0 : i32
    %c0_i32_1 = arith.constant 0 : i32
    return %c0_i32, %c0_i32_0 : i32, i32
  }
  func.func @transform_9(%arg0: i32) -> (i32, i32) {
    %c0_i32 = arith.constant 0 : i32
    %c0_i32_0 = arith.constant 0 : i32
    %c0_i32_1 = arith.constant 0 : i32
    return %c0_i32, %c0_i32_0 : i32, i32
  }
  func.func @transform_10(%arg0: i32) -> (i32, i32) {
    %c0_i32 = arith.constant 0 : i32
    %c0_i32_0 = arith.constant 0 : i32
    %c0_i32_1 = arith.constant 0 : i32
    return %c0_i32, %c0_i32_0 : i32, i32
  }
  func.func @transform_11(%arg0: i32) -> (i32, i32) {
    %c0_i32 = arith.constant 0 : i32
    %c0_i32_0 = arith.constant 0 : i32
    %c0_i32_1 = arith.constant 0 : i32
    return %c0_i32, %c0_i32_0 : i32, i32
  }
  func.func @transform_12(%arg0: i32) -> (i32, i32) {
    %c0_i32 = arith.constant 0 : i32
    %c0_i32_0 = arith.constant 0 : i32
    %c0_i32_1 = arith.constant 0 : i32
    return %c0_i32, %c0_i32_0 : i32, i32
  }
  func.func @transform_13(%arg0: i32) -> (i32, i32) {
    %c0_i32 = arith.constant 0 : i32
    %c0_i32_0 = arith.constant 0 : i32
    return %arg0, %c0_i32 : i32, i32
  }
}

</mosaic_0001>

<bundles_post_ra>
// kernel: layer_set_forward.1
= control target key start
LH: loop header
LB: loop body
LE: loop exit
PB: predicated region body
PF: predicated region fallthrough
CT: control target
= control target key end

     0   :  { %v886_v0 = vmov 0.0|0.0   ;;  %vm887_vm0 = vmmov 0   ;;  %v888_v4 = vmov 0.0   ;;  %s1228_s1 = inlined_call_operand.vmem [shape: f32[128,128], index: 1, kind: input, shape index: {}]   ;;  %s1229_s0 = inlined_call_operand.vmem [shape: f32[24,128], index: 0, kind: input, shape index: {}]   ;;  %s1230_s2 = inlined_call_operand.vmem [shape: f32[1,128], index: 2, kind: input, shape index: {}]   ;;  %s1231_s5 = inlined_call_operand.vmem [shape: f32[128,128], index: 5, kind: input, shape index: {}]   ;;  %s1232_s3 = inlined_call_operand.vmem [shape: f32[1,128], index: 3, kind: input, shape index: {}]   ;;  %s1233_s4 = inlined_call_operand.vmem [shape: f32[1,128], index: 4, kind: input, shape index: {}]   ;;  %s1234_s6 = inlined_call_operand.vmem [shape: f32[1,128], index: 6, kind: input, shape index: {}]   ;;  %s1235_s9 = inlined_call_operand.vmem [shape: f32[128,128], index: 9, kind: input, shape index: {}]   ;;  %s1236_s7 = inlined_call_operand.vmem [shape: f32[1,128], index: 7, kind: input, shape index: {}]   ;;  %s1237_s8 = inlined_call_operand.vmem [shape: f32[1,128], index: 8, kind: input, shape index: {}]   ;;  %s1238_s10 = inlined_call_operand.vmem [shape: f32[1,128], index: 10, kind: input, shape index: {}]   ;;  %s1239_s11 = inlined_call_operand.vmem [shape: f32[1,128], index: 11, kind: input, shape index: {}]   ;;  %s1240_s12 = inlined_call_operand.vmem [shape: f32[1,128], index: 12, kind: input, shape index: {}]   ;;  %s1241_s13 = inlined_call_operand.vmem [shape: f32[24,128], index: 13, kind: output, shape index: {}]  }
   0x1   :  { %765 = vmatprep.subr.bf16.mxu0 %v886_v0  ;;  %v47_v1 = vld [vmem:[%s1228_s1] sm:$0xff]  ;;  %v48_v2 = vld [vmem:[%s1228_s1 + $0x8] sm:$0xff]  ;;  %v49_v3 = vld [vmem:[%s1228_s1 + $0x10] sm:$0xff]  ;;  %674 = vmatprep.mubr.msk.f32.mxu0 %vm887_vm0, %v888_v4 }
   0x2   :  { %v766_v5 = vpack.c.bf16 %v48_v2, %v47_v1  ;;  %v50_v6 = vld [vmem:[%s1228_s1 + $0x18] sm:$0xff]  ;;  %789 = vmatprep.subr.bf16.mxu1 %v886_v0  ;;  %715 = vmatprep.mubr.msk.f32.mxu1 %vm887_vm0, %v888_v4  ;;  %v51_v8 = vld [vmem:[%s1228_s1 + $0x20] sm:$0xff]  ;;  %v52_v9 = vld [vmem:[%s1228_s1 + $0x28] sm:$0xff] }
   0x3   :  { %v769_v7 = vpack.c.bf16 %v50_v6, %v49_v3  ;;  %v772_v10 = vpack.c.bf16 %v52_v9, %v51_v8  ;;  %v53_v11 = vld [vmem:[%s1228_s1 + $0x30] sm:$0xff]  ;;  %v54_v12 = vld [vmem:[%s1228_s1 + $0x38] sm:$0xff]  ;;  %v55_v14 = vld [vmem:[%s1228_s1 + $0x40] sm:$0xff] }
   0x4   :  { %767 = vmatpush3.bf16.msra.mxu0 %v766_v5  ;;  %v775_v13 = vpack.c.bf16 %v54_v12, %v53_v11  ;;  %v56_v15 = vld [vmem:[%s1228_s1 + $0x48] sm:$0xff]  ;;  %v57_v17 = vld [vmem:[%s1228_s1 + $0x50] sm:$0xff]  ;;  %v58_v18 = vld [vmem:[%s1228_s1 + $0x58] sm:$0xff] }
   0x5   :  { %768 = vmatprep.subr.bf16.mxu0 %v886_v0  ;;  %v778_v16 = vpack.c.bf16 %v56_v15, %v55_v14  ;;  %v781_v19 = vpack.c.bf16 %v58_v18, %v57_v17  ;;  %v59_v20 = vld [vmem:[%s1228_s1 + $0x60] sm:$0xff]  ;;  %v60_v21 = vld [vmem:[%s1228_s1 + $0x68] sm:$0xff]  ;;  %v61_v23 = vld [vmem:[%s1228_s1 + $0x70] sm:$0xff] }
   0x6   :  { %v784_v22 = vpack.c.bf16 %v60_v21, %v59_v20  ;;  %v62_v24 = vld [vmem:[%s1228_s1 + $0x78] sm:$0xff]  ;;  %v44_v26 = vld [vmem:[%s1229_s0] sm:$0xff]  ;;  %v45_v27 = vld [vmem:[%s1229_s0 + $0x8] sm:$0xff] }
   0x7   :  { %v787_v25 = vpack.c.bf16 %v62_v24, %v61_v23  ;;  %v46_v28 = vld [vmem:[%s1229_s0 + $0x10] sm:$0xff]  ;;  %v576_v29 = vld [vmem:[%s1230_s2] ss:$0 sm:$0xff]  ;;  %v213_v40 = vld [vmem:[%s1231_s5 + $0x8] sm:$0xff] }
   0x8   :  { %770 = vmatpush3.bf16.msra.mxu0 %v769_v7  ;;  %v212_v39 = vld [vmem:[%s1231_s5] sm:$0xff]  ;;  %v214_v41 = vld [vmem:[%s1231_s5 + $0x10] sm:$0xff]  ;;  %v215_v43 = vld [vmem:[%s1231_s5 + $0x18] sm:$0xff] }
   0x9   :  { %771 = vmatprep.subr.bf16.mxu0 %v886_v0  ;;  %v790_v42 = vpack.c.bf16 %v213_v40, %v212_v39  ;;  %v793_v44 = vpack.c.bf16 %v215_v43, %v214_v41  ;;  %v216_v57 = vld [vmem:[%s1231_s5 + $0x20] sm:$0xff]  ;;  %v217_v58 = vld [vmem:[%s1231_s5 + $0x28] sm:$0xff]  ;;  %v218_v60 = vld [vmem:[%s1231_s5 + $0x30] sm:$0xff] }
   0xa   :  { %v796_v59 = vpack.c.bf16 %v217_v58, %v216_v57  ;;  %v219_v61 = vld [vmem:[%s1231_s5 + $0x38] sm:$0xff]  ;;  %v220_v63 = vld [vmem:[%s1231_s5 + $0x40] sm:$0xff]  ;;  %v221_v1 = vld [vmem:[%s1231_s5 + $0x48] sm:$0xff] }
   0xb   :  { %791 = vmatpush3.bf16.msra.mxu1 %v790_v42  ;;  %v799_v62 = vpack.c.bf16 %v219_v61, %v218_v60  ;;  %v802_v2 = vpack.c.bf16 %v221_v1, %v220_v63  ;;  %v222_v3 = vld [vmem:[%s1231_s5 + $0x50] sm:$0xff]  ;;  %v223_v5 = vld [vmem:[%s1231_s5 + $0x58] sm:$0xff]  ;;  %v224_v7 = vld [vmem:[%s1231_s5 + $0x60] sm:$0xff] }
   0xc   :  { %773 = vmatpush3.bf16.msra.mxu0 %v772_v10  ;;  %792 = vmatprep.subr.bf16.mxu1 %v886_v0  ;;  %v805_v6 = vpack.c.bf16 %v223_v5, %v222_v3  ;;  %v225_v8 = vld [vmem:[%s1231_s5 + $0x68] sm:$0xff]  ;;  %v226_v10 = vld [vmem:[%s1231_s5 + $0x70] sm:$0xff]  ;;  %v227_v11 = vld [vmem:[%s1231_s5 + $0x78] sm:$0xff] }
   0xd   :  { %774 = vmatprep.subr.bf16.mxu0 %v886_v0  ;;  %v808_v9 = vpack.c.bf16 %v225_v8, %v224_v7  ;;  %v811_v12 = vpack.c.bf16 %v227_v11, %v226_v10  ;;  %v379_v57 = vld [vmem:[%s1235_s9 + $0x10] sm:$0xff]  ;;  %v381_v11 = vld [vmem:[%s1235_s9 + $0x20] sm:$0xff] }
   0xf   :  { %794 = vmatpush3.bf16.msra.mxu1 %v793_v44 }
  0x10   :  { %776 = vmatpush3.bf16.msra.mxu0 %v775_v13  ;;  %795 = vmatprep.subr.bf16.mxu1 %v886_v0 }
  0x11   :  { %777 = vmatprep.subr.bf16.mxu0 %v886_v0 }
  0x13   :  { %797 = vmatpush3.bf16.msra.mxu1 %v796_v59  ;;  %v380_v59 = vld [vmem:[%s1235_s9 + $0x18] sm:$0xff] }
  0x14   :  { %779 = vmatpush3.bf16.msra.mxu0 %v778_v16  ;;  %798 = vmatprep.subr.bf16.mxu1 %v886_v0  ;;  %v817_v60 = vpack.c.bf16 %v380_v59, %v379_v57 }
  0x15   :  { %780 = vmatprep.subr.bf16.mxu0 %v886_v0 }
  0x17   :  { %800 = vmatpush3.bf16.msra.mxu1 %v799_v62 }
  0x18   :  { %782 = vmatpush3.bf16.msra.mxu0 %v781_v19  ;;  %801 = vmatprep.subr.bf16.mxu1 %v886_v0 }
  0x19   :  { %783 = vmatprep.subr.bf16.mxu0 %v886_v0 }
  0x1b   :  { %803 = vmatpush3.bf16.msra.mxu1 %v802_v2 }
  0x1c   :  { %785 = vmatpush3.bf16.msra.mxu0 %v784_v22  ;;  %804 = vmatprep.subr.bf16.mxu1 %v886_v0 }
  0x1d   :  { %786 = vmatprep.subr.bf16.mxu0 %v886_v0 }
  0x1f   :  { %806 = vmatpush3.bf16.msra.mxu1 %v805_v6 }
  0x20   :  { %788 = vmatpush3.bf16.msra.mxu0 %v787_v25  ;;  %807 = vmatprep.subr.bf16.mxu1 %v886_v0 }
  0x21   :  { %813 = vmatprep.subr.bf16.mxu0 %v886_v0 }
  0x23   :  { %675 = vmatmul.mubr.f32.vlgmr.msra.gmra.mrb[0].mxu0 %v44_v26  ;;  %809 = vmatpush3.bf16.msra.mxu1 %v808_v9 }
  0x24   :  { %677 = vmatprep.mubr.msk.f32.mxu0 %vm887_vm0, %v888_v4  ;;  %810 = vmatprep.subr.bf16.mxu1 %v886_v0 }
  0x27   :  { %678 = vmatmul.mubr.f32.gmra.mrb[2].mxu0 %v45_v27  ;;  %812 = vmatpush3.bf16.msra.mxu1 %v811_v12  ;;  %v382_v12 = vld [vmem:[%s1235_s9 + $0x28] sm:$0xff] }
  0x28   :  { %680 = vmatprep.mubr.msk.f32.mxu0 %vm887_vm0, %v888_v4  ;;  %837 = vmatprep.subr.bf16.mxu1 %v886_v0 }
  0x2b   :  { %681 = vmatmul.mubr.f32.gmra.mrb[4].mxu0 %v46_v28 }
  0x2c   :  { %756 = vmatprep.mubr.msk.f32.mxu0 %vm887_vm0, %v888_v4 }
  0xf6   :  { %v136_v30 = vpop.f32.mrb[0].mxu0 }
  0xf7   :  { %v137_v31 = vadd.f32 %v576_v29, %v136_v30  ;;  %v676_v32 = vpop.f32.mrb[1].mxu0 }
  0xf9   :  { %152 = vadd.xlane.f32.xlu0 %v137_v31 }
  0xfa   :  { %v141_v33 = vpop.f32.mrb[2].mxu0 }
  0xfb   :  { %v142_v34 = vadd.f32 %v576_v29, %v141_v33  ;;  %v679_v35 = vpop.f32.mrb[3].mxu0 }
  0xfd   :  { %154 = vadd.xlane.f32.xlu0 %v142_v34 }
  0xfe   :  { %v146_v36 = vpop.f32.mrb[4].mxu0 }
  0xff   :  { %v147_v37 = vadd.f32 %v576_v29, %v146_v36  ;;  %v682_v38 = vpop.f32.mrb[5].mxu0 }
 0x101   :  { %156 = vadd.xlane.f32.xlu1 %v147_v37 }
 0x186   :  { %v153_v45 = vpop.xlane.xlu0 %152 }
 0x187   :  { %v158_v46 = vmul.f32 0.03125, %v153_v45  ;;  %v579_v45 = vld [vmem:[%s1234_s6] ss:$0 sm:$0xff] }
 0x189   :  { %v1053_v47 = vsub.f32 %v137_v31, %v158_v46  ;;  %v173_v13 = vmul.f32 %v158_v46, %v158_v46  ;;  %v577_v31 = vld [vmem:[%s1232_s3] ss:$0 sm:$0xff] }
 0x18a   :  { %v155_v48 = vpop.xlane.xlu0 %154 }
 0x18b   :  { %v159_v49 = vmul.f32 0.03125, %v155_v48  ;;  %v164_v50 = vmul.f32 %v1053_v47, %v1053_v47  ;;  %v176_v15 = vmul.f32 96.0, %v173_v13  ;;  %v820_v13 = vpack.c.bf16 %v382_v12, %v381_v11 }
 0x18d   :  { %v1057_v51 = vsub.f32 %v142_v34, %v159_v49  ;;  %167 = vadd.xlane.f32.xlu1 %v164_v50  ;;  %v174_v14 = vmul.f32 %v159_v49, %v159_v49  ;;  %v578_v34 = vld [vmem:[%s1233_s4] ss:$0 sm:$0xff] }
 0x18e   :  { %v157_v52 = vpop.xlane.xlu1 %156 }
 0x18f   :  { %v160_v53 = vmul.f32 0.03125, %v157_v52  ;;  %v165_v54 = vmul.f32 %v1057_v51, %v1057_v51  ;;  %v177_v20 = vmul.f32 96.0, %v174_v14  ;;  %v383_v14 = vld [vmem:[%s1235_s9 + $0x30] sm:$0xff] }
 0x191   :  { %v1061_v55 = vsub.f32 %v147_v37, %v160_v53  ;;  %169 = vadd.xlane.f32.xlu0 %v165_v54  ;;  %v175_v18 = vmul.f32 %v160_v53, %v160_v53 }
 0x193   :  { %v166_v56 = vmul.f32 %v1061_v55, %v1061_v55  ;;  %v178_v25 = vmul.f32 96.0, %v175_v18  ;;  %v386_v18 = vld [vmem:[%s1235_s9 + $0x48] sm:$0xff] }
 0x195   :  { %171 = vadd.xlane.f32.xlu1 %v166_v56  ;;  %v378_v56 = vld [vmem:[%s1235_s9 + $0x8] sm:$0xff] }
 0x21a   :  { %v168_v16 = vpop.xlane.xlu1 %167 }
 0x21b   :  { %v179_v17 = vsub.f32 %v168_v16, %v176_v15  ;;  %v384_v15 = vld [vmem:[%s1235_s9 + $0x38] sm:$0xff] }
 0x21c   :  { %v823_v16 = vpack.c.bf16 %v384_v15, %v383_v14 }
 0x21d   :  { %v182_v19 = vmul.f32 0.03125, %v179_v17  ;;  %v385_v17 = vld [vmem:[%s1235_s9 + $0x40] sm:$0xff] }
 0x21e   :  { %v170_v21 = vpop.xlane.xlu0 %169 }
 0x21f   :  { %v185_v22 = vadd.f32 1e-05, %v182_v19  ;;  %v180_v23 = vsub.f32 %v170_v21, %v177_v20  ;;  %v826_v19 = vpack.c.bf16 %v386_v18, %v385_v17  ;;  %v387_v20 = vld [vmem:[%s1235_s9 + $0x50] sm:$0xff]  ;;  %v388_v21 = vld [vmem:[%s1235_s9 + $0x58] sm:$0xff] }
 0x221   :  { %856 = vrsqrt.f32 %v185_v22  ;;  %v183_v24 = vmul.f32 0.03125, %v180_v23  ;;  %v829_v22 = vpack.c.bf16 %v388_v21, %v387_v20  ;;  %v389_v23 = vld [vmem:[%s1235_s9 + $0x60] sm:$0xff] }
 0x222   :  { %v172_v26 = vpop.xlane.xlu1 %171 }
 0x223   :  { %v186_v27 = vadd.f32 1e-05, %v183_v24  ;;  %v181_v28 = vsub.f32 %v172_v26, %v178_v25  ;;  %v390_v24 = vld [vmem:[%s1235_s9 + $0x68] sm:$0xff]  ;;  %v391_v26 = vld [vmem:[%s1235_s9 + $0x70] sm:$0xff] }
 0x224   :  { %v832_v25 = vpack.c.bf16 %v390_v24, %v389_v23 }
 0x225   :  { %858 = vrsqrt.f32 %v186_v27  ;;  %v184_v29 = vmul.f32 0.03125, %v181_v28  ;;  %v392_v27 = vld [vmem:[%s1235_s9 + $0x78] sm:$0xff] }
 0x226   :  { %v835_v28 = vpack.c.bf16 %v392_v27, %v391_v26 }
 0x227   :  { %v187_v30 = vadd.f32 1e-05, %v184_v29 }
 0x229   :  { %860 = vrsqrt.f32 %v187_v30 }
 0x22b   :  { %v857_v32 = vpop.eup %856 }
 0x22c   :  { %v197_v33 = vmul.f32 %v857_v32, %v577_v31 }
 0x22e   :  { %v200_v35 = vmul.f32 %v197_v33, %v1053_v47 }
 0x22f   :  { %v859_v36 = vpop.eup %858 }
 0x230   :  { %v209_v37 = vadd.f32 %v578_v34, %v200_v35  ;;  %v198_v38 = vmul.f32 %v859_v36, %v577_v31 }
 0x232   :  { %716 = vmatmul.mubr.f32.vlgmr.msra.gmra.mrb[0].mxu1 %v209_v37  ;;  %v201_v39 = vmul.f32 %v198_v38, %v1057_v51 }
 0x233   :  { %v861_v40 = vpop.eup %860  ;;  %718 = vmatprep.mubr.msk.f32.mxu1 %vm887_vm0, %v888_v4 }
 0x234   :  { %v210_v41 = vadd.f32 %v578_v34, %v201_v39  ;;  %v199_v42 = vmul.f32 %v861_v40, %v577_v31 }
 0x236   :  { %719 = vmatmul.mubr.f32.gmra.mrb[2].mxu1 %v210_v41  ;;  %v202_v43 = vmul.f32 %v199_v42, %v1061_v55  ;;  %v377_v55 = vld [vmem:[%s1235_s9] sm:$0xff] }
 0x237   :  { %721 = vmatprep.mubr.msk.f32.mxu1 %vm887_vm0, %v888_v4  ;;  %v814_v58 = vpack.c.bf16 %v378_v56, %v377_v55 }
 0x238   :  { %v211_v44 = vadd.f32 %v578_v34, %v202_v43 }
 0x239   :  { %815 = vmatpush3.bf16.msra.mxu0 %v814_v58  ;;  %845 = vmatpush3.bf16.msra.mxu1 %v814_v58 }
 0x23a   :  { %722 = vmatmul.mubr.f32.gmra.mrb[4].mxu1 %v211_v44  ;;  %816 = vmatprep.subr.bf16.mxu0 %v886_v0 }
 0x23b   :  { %759 = vmatprep.mubr.msk.f32.mxu1 %vm887_vm0, %v888_v4  ;;  %838 = vmatprep.subr.bf16.mxu1 %v886_v0 }
 0x23d   :  { %818 = vmatpush3.bf16.msra.mxu0 %v817_v60  ;;  %846 = vmatpush3.bf16.msra.mxu1 %v817_v60  ;;  %v582_v60 = vld [vmem:[%s1238_s10] ss:$0 sm:$0xff] }
 0x23e   :  { %819 = vmatprep.subr.bf16.mxu0 %v886_v0  ;;  %839 = vmatprep.subr.bf16.mxu1 %v886_v0 }
 0x241   :  { %821 = vmatpush3.bf16.msra.mxu0 %v820_v13  ;;  %847 = vmatpush3.bf16.msra.mxu1 %v820_v13 }
 0x242   :  { %822 = vmatprep.subr.bf16.mxu0 %v886_v0  ;;  %840 = vmatprep.subr.bf16.mxu1 %v886_v0 }
 0x245   :  { %824 = vmatpush3.bf16.msra.mxu0 %v823_v16  ;;  %848 = vmatpush3.bf16.msra.mxu1 %v823_v16 }
 0x246   :  { %825 = vmatprep.subr.bf16.mxu0 %v886_v0  ;;  %841 = vmatprep.subr.bf16.mxu1 %v886_v0 }
 0x249   :  { %827 = vmatpush3.bf16.msra.mxu0 %v826_v19  ;;  %849 = vmatpush3.bf16.msra.mxu1 %v826_v19 }
 0x24a   :  { %828 = vmatprep.subr.bf16.mxu0 %v886_v0  ;;  %842 = vmatprep.subr.bf16.mxu1 %v886_v0 }
 0x24d   :  { %830 = vmatpush3.bf16.msra.mxu0 %v829_v22  ;;  %850 = vmatpush3.bf16.msra.mxu1 %v829_v22 }
 0x24e   :  { %831 = vmatprep.subr.bf16.mxu0 %v886_v0  ;;  %843 = vmatprep.subr.bf16.mxu1 %v886_v0 }
 0x251   :  { %833 = vmatpush3.bf16.msra.mxu0 %v832_v25  ;;  %851 = vmatpush3.bf16.msra.mxu1 %v832_v25 }
 0x252   :  { %834 = vmatprep.subr.bf16.mxu0 %v886_v0  ;;  %844 = vmatprep.subr.bf16.mxu1 %v886_v0 }
 0x255   :  { %836 = vmatpush3.bf16.msra.mxu0 %v835_v28  ;;  %852 = vmatpush3.bf16.msra.mxu1 %v835_v28 }
 0x305   :  { %v301_v46 = vpop.f32.mrb[0].mxu1 }
 0x306   :  { %v302_v47 = vadd.f32 %v579_v45, %v301_v46  ;;  %v717_v48 = vpop.f32.mrb[1].mxu1  ;;  %v580_v46 = vld [vmem:[%s1236_s7] ss:$0 sm:$0xff] }
 0x308   :  { %317 = vadd.xlane.f32.xlu1 %v302_v47 }
 0x309   :  { %v306_v49 = vpop.f32.mrb[2].mxu1 }
 0x30a   :  { %v307_v50 = vadd.f32 %v579_v45, %v306_v49  ;;  %v720_v51 = vpop.f32.mrb[3].mxu1  ;;  %v581_v49 = vld [vmem:[%s1237_s8] ss:$0 sm:$0xff] }
 0x30c   :  { %319 = vadd.xlane.f32.xlu0 %v307_v50 }
 0x30d   :  { %v311_v52 = vpop.f32.mrb[4].mxu1 }
 0x30e   :  { %v312_v53 = vadd.f32 %v579_v45, %v311_v52  ;;  %v723_v54 = vpop.f32.mrb[5].mxu1 }
 0x310   :  { %321 = vadd.xlane.f32.xlu0 %v312_v53 }
 0x395   :  { %v318_v61 = vpop.xlane.xlu1 %317 }
 0x396   :  { %v323_v62 = vmul.f32 0.03125, %v318_v61 }
 0x398   :  { %v1141_v63 = vsub.f32 %v302_v47, %v323_v62  ;;  %v338_v29 = vmul.f32 %v323_v62, %v323_v62 }
 0x399   :  { %v320_v1 = vpop.xlane.xlu0 %319 }
 0x39a   :  { %v324_v2 = vmul.f32 0.03125, %v320_v1  ;;  %v329_v3 = vmul.f32 %v1141_v63, %v1141_v63  ;;  %v341_v31 = vmul.f32 96.0, %v338_v29 }
 0x39c   :  { %v1145_v5 = vsub.f32 %v307_v50, %v324_v2  ;;  %332 = vadd.xlane.f32.xlu0 %v329_v3  ;;  %v339_v30 = vmul.f32 %v324_v2, %v324_v2 }
 0x39d   :  { %v322_v6 = vpop.xlane.xlu0 %321 }
 0x39e   :  { %v325_v7 = vmul.f32 0.03125, %v322_v6  ;;  %v330_v8 = vmul.f32 %v1145_v5, %v1145_v5  ;;  %v342_v36 = vmul.f32 96.0, %v339_v30 }
 0x3a0   :  { %v1149_v9 = vsub.f32 %v312_v53, %v325_v7  ;;  %334 = vadd.xlane.f32.xlu1 %v330_v8  ;;  %v340_v34 = vmul.f32 %v325_v7, %v325_v7 }
 0x3a2   :  { %v331_v10 = vmul.f32 %v1149_v9, %v1149_v9  ;;  %v343_v41 = vmul.f32 96.0, %v340_v34 }
 0x3a4   :  { %336 = vadd.xlane.f32.xlu1 %v331_v10 }
 0x429   :  { %v333_v32 = vpop.xlane.xlu0 %332 }
 0x42a   :  { %v344_v33 = vsub.f32 %v333_v32, %v341_v31 }
 0x42c   :  { %v347_v35 = vmul.f32 0.03125, %v344_v33 }
 0x42d   :  { %v335_v37 = vpop.xlane.xlu1 %334 }
 0x42e   :  { %v350_v38 = vadd.f32 1e-05, %v347_v35  ;;  %v345_v39 = vsub.f32 %v335_v37, %v342_v36  ;;  %v583_v37 = vld [vmem:[%s1239_s11] ss:$0 sm:$0xff] }
 0x430   :  { %862 = vrsqrt.f32 %v350_v38  ;;  %v348_v40 = vmul.f32 0.03125, %v345_v39 }
 0x431   :  { %v337_v42 = vpop.xlane.xlu1 %336 }
 0x432   :  { %v351_v43 = vadd.f32 1e-05, %v348_v40  ;;  %v346_v0 = vsub.f32 %v337_v42, %v343_v41  ;;  %v584_v40 = vld [vmem:[%s1240_s12] ss:$0 sm:$0xff] }
 0x434   :  { %864 = vrsqrt.f32 %v351_v43  ;;  %v349_v44 = vmul.f32 0.03125, %v346_v0 }
 0x436   :  { %v352_v45 = vadd.f32 1e-05, %v349_v44 }
 0x438   :  { %866 = vrsqrt.f32 %v352_v45 }
 0x43a   :  { %v863_v47 = vpop.eup %862 }
 0x43b   :  { %v362_v48 = vmul.f32 %v863_v47, %v580_v46 }
 0x43d   :  { %v365_v50 = vmul.f32 %v362_v48, %v1141_v63 }
 0x43e   :  { %v865_v51 = vpop.eup %864 }
 0x43f   :  { %v363_v52 = vmul.f32 %v865_v51, %v580_v46  ;;  %v374_v53 = vadd.f32 %v581_v49, %v365_v50 }
 0x441   :  { %757 = vmatmul.mubr.f32.vlgmr.msra.gmra.mrb[6].mxu0 %v374_v53  ;;  %v366_v54 = vmul.f32 %v363_v52, %v1145_v5 }
 0x442   :  { %v867_v55 = vpop.eup %866 }
 0x443   :  { %v375_v56 = vadd.f32 %v581_v49, %v366_v54  ;;  %v364_v57 = vmul.f32 %v867_v55, %v580_v46 }
 0x445   :  { %760 = vmatmul.mubr.f32.vlgmr.msra.gmra.mrb[6].mxu1 %v375_v56  ;;  %v367_v58 = vmul.f32 %v364_v57, %v1149_v9 }
 0x446   :  { %762 = vmatprep.mubr.msk.f32.mxu1 %vm887_vm0, %v888_v4 }
 0x447   :  { %v376_v59 = vadd.f32 %v581_v49, %v367_v58 }
 0x449   :  { %763 = vmatmul.mubr.f32.gmra.mrb[8].mxu1 %v376_v59 }
 0x514   :  { %v466_v61 = vpop.f32.mrb[6].mxu0 }
 0x515   :  { %v467_v62 = vadd.f32 %v582_v60, %v466_v61  ;;  %v758_v63 = vpop.f32.mrb[7].mxu0 }
 0x517   :  { %482 = vadd.xlane.f32.xlu0 %v467_v62 }
 0x518   :  { %v471_v1 = vpop.f32.mrb[6].mxu1 }
 0x519   :  { %v472_v2 = vadd.f32 %v582_v60, %v471_v1  ;;  %v761_v3 = vpop.f32.mrb[7].mxu1 }
 0x51b   :  { %484 = vadd.xlane.f32.xlu1 %v472_v2 }
 0x51c   :  { %v476_v5 = vpop.f32.mrb[8].mxu1 }
 0x51d   :  { %v477_v6 = vadd.f32 %v582_v60, %v476_v5  ;;  %v764_v7 = vpop.f32.mrb[9].mxu1 }
 0x51f   :  { %486 = vadd.xlane.f32.xlu0 %v477_v6 }
 0x5a4   :  { %v483_v8 = vpop.xlane.xlu0 %482 }
 0x5a5   :  { %v488_v4 = vmul.f32 0.0625, %v483_v8 }
 0x5a7   :  { %v491_v9 = vsub.f32 %v467_v62, %v488_v4  ;;  %v503_v19 = vmul.f32 %v488_v4, %v488_v4 }
 0x5a8   :  { %v485_v10 = vpop.xlane.xlu1 %484 }
 0x5a9   :  { %v489_v11 = vmul.f32 0.0625, %v485_v10  ;;  %v494_v12 = vmul.f32 %v491_v9, %v491_v9  ;;  %v506_v21 = vmul.f32 112.0, %v503_v19 }
 0x5ab   :  { %v492_v13 = vsub.f32 %v472_v2, %v489_v11  ;;  %497 = vadd.xlane.f32.xlu1 %v494_v12  ;;  %v504_v20 = vmul.f32 %v489_v11, %v489_v11 }
 0x5ac   :  { %v487_v14 = vpop.xlane.xlu0 %486 }
 0x5ad   :  { %v490_v15 = vmul.f32 0.0625, %v487_v14  ;;  %v495_v16 = vmul.f32 %v492_v13, %v492_v13  ;;  %v507_v26 = vmul.f32 112.0, %v504_v20 }
 0x5af   :  { %v493_v17 = vsub.f32 %v477_v6, %v490_v15  ;;  %499 = vadd.xlane.f32.xlu0 %v495_v16  ;;  %v505_v24 = vmul.f32 %v490_v15, %v490_v15 }
 0x5b1   :  { %v496_v18 = vmul.f32 %v493_v17, %v493_v17  ;;  %v508_v31 = vmul.f32 112.0, %v505_v24 }
 0x5b3   :  { %501 = vadd.xlane.f32.xlu1 %v496_v18 }
 0x638   :  { %v498_v22 = vpop.xlane.xlu1 %497 }
 0x639   :  { %v509_v23 = vsub.f32 %v498_v22, %v506_v21 }
 0x63b   :  { %v512_v25 = vmul.f32 0.0625, %v509_v23 }
 0x63c   :  { %v500_v27 = vpop.xlane.xlu0 %499 }
 0x63d   :  { %v515_v28 = vadd.f32 1e-05, %v512_v25  ;;  %v510_v29 = vsub.f32 %v500_v27, %v507_v26 }
 0x63f   :  { %868 = vrsqrt.f32 %v515_v28  ;;  %v513_v30 = vmul.f32 0.0625, %v510_v29 }
 0x640   :  { %v502_v32 = vpop.xlane.xlu1 %501 }
 0x641   :  { %v516_v33 = vadd.f32 1e-05, %v513_v30  ;;  %v511_v34 = vsub.f32 %v502_v32, %v508_v31 }
 0x643   :  { %870 = vrsqrt.f32 %v516_v33  ;;  %v514_v35 = vmul.f32 0.0625, %v511_v34 }
 0x645   :  { %v517_v36 = vadd.f32 1e-05, %v514_v35 }
 0x647   :  { %872 = vrsqrt.f32 %v517_v36 }
 0x649   :  { %v869_v38 = vpop.eup %868 }
 0x64a   :  { %v527_v39 = vmul.f32 %v869_v38, %v583_v37 }
 0x64c   :  { %v530_v41 = vmul.f32 %v527_v39, %v491_v9 }
 0x64d   :  { %v871_v42 = vpop.eup %870 }
 0x64e   :  { %v539_v43 = vadd.f32 %v584_v40, %v530_v41  ;;  %v528_v0 = vmul.f32 %v871_v42, %v583_v37 }
 0x650   :  { %v542_v44 = vmin.f32 %v539_v43, 30.0  ;;  %v531_v45 = vmul.f32 %v528_v0, %v492_v13 }
 0x651   :  { %v873_v46 = vpop.eup %872 }
 0x652   :  { %v545_v47 = vmul.f32 1.442695, %v542_v44  ;;  %v540_v48 = vadd.f32 %v584_v40, %v531_v45  ;;  %v529_v49 = vmul.f32 %v873_v46, %v583_v37 }
 0x654   :  { %874 = vpow2.f32 %v545_v47  ;;  %v543_v50 = vmin.f32 %v540_v48, 30.0  ;;  %v532_v51 = vmul.f32 %v529_v49, %v493_v17 }
 0x656   :  { %v547_v52 = vmul.f32 1.442695, %v543_v50  ;;  %v541_v53 = vadd.f32 %v584_v40, %v532_v51 }
 0x658   :  { %876 = vpow2.f32 %v547_v52  ;;  %v544_v54 = vmin.f32 %v541_v53, 30.0 }
 0x65a   :  { %v549_v55 = vmul.f32 1.442695, %v544_v54 }
 0x65c   :  { %878 = vpow2.f32 %v549_v55 }
 0x65e   :  { %v875_v56 = vpop.eup %874 }
 0x65f   :  { %v551_v57 = vadd.f32 2.0, %v875_v56 }
 0x661   :  { %v554_v58 = vmul.f32 %v875_v56, %v551_v57 }
 0x662   :  { %v877_v59 = vpop.eup %876 }
 0x663   :  { %v557_v60 = vadd.f32 2.0, %v554_v58  ;;  %v552_v61 = vadd.f32 2.0, %v877_v59 }
 0x665   :  { %880 = vrcp.f32 %v557_v60  ;;  %v555_v62 = vmul.f32 %v877_v59, %v552_v61 }
 0x666   :  { %v879_v63 = vpop.eup %878 }
 0x667   :  { %v558_v1 = vadd.f32 2.0, %v555_v62  ;;  %v553_v2 = vadd.f32 2.0, %v879_v63 }
 0x669   :  { %882 = vrcp.f32 %v558_v1  ;;  %v556_v3 = vmul.f32 %v879_v63, %v553_v2 }
 0x66b   :  { %v559_v5 = vadd.f32 2.0, %v556_v3 }
 0x66d   :  { %884 = vrcp.f32 %v559_v5 }
 0x66f   :  { %v881_v6 = vpop.eup %880 }
 0x670   :  { %v561_v7 = vmul.f32 %v881_v6, %v554_v58 }
 0x672   :  { %v566_v8 = vmul.f32 %v561_v7, %v539_v43 }
 0x673   :  { %v883_v4 = vpop.eup %882 }
 0x674   :  { %569 = vst [vmem:[%s1241_s13] sm:$0xff] %v566_v8  ;;  %v563_v9 = vmul.f32 %v883_v4, %v555_v62 }
 0x676   :  { %v567_v10 = vmul.f32 %v563_v9, %v540_v48 }
 0x677   :  { %v885_v11 = vpop.eup %884 }
 0x678   :  { %570 = vst [vmem:[%s1241_s13 + $0x8] sm:$0xff] %v567_v10  ;;  %v565_v12 = vmul.f32 %v885_v11, %v556_v3 }
 0x67a   :  { %v568_v13 = vmul.f32 %v565_v12, %v541_v53 }
 0x67c   :  { %571 = vst [vmem:[%s1241_s13 + $0x10] sm:$0xff] %v568_v13 }

</bundles_post_ra>
